<compile_context>
chip_gen: v7x
topology: tpu7x:2x2x1
jax: 0.10.0
libtpu: 0.0.40
codegen_flags: <defaults>
</compile_context>

<pallas_src>
import jax
import jax.numpy as jnp
from jax.experimental import pallas as pl
from jax.experimental.pallas import tpu as pltpu


def _make_kernel(hw):
    inv_hw = 1.0 / float(hw)

    def kernel(x_ref, w1t_ref, b1_ref, w2t_ref, b2_ref, o_ref):
        # x block: (Bt, C, HW), native dtype.  Only the tiny pooled vectors
        # are promoted to f32.
        x = x_ref[...]
        bt = x.shape[0]

        # ---- spatial pooling over the lane axis -----------------------------
        avg = jnp.sum(x, axis=-1, dtype=jnp.float32) * inv_hw        # (Bt, C)
        mx = jnp.max(x, axis=-1).astype(jnp.float32)                 # (Bt, C)

        # ---- shared MLP fc2(fc1(.)), run once on stacked [avg; max] ---------
        pooled = jnp.concatenate([avg, mx], axis=0)                  # (2Bt, C)
        h = jnp.dot(pooled, w1t_ref[...],
                    preferred_element_type=jnp.float32) + b1_ref[...]
        y = jnp.dot(h, w2t_ref[...],
                    preferred_element_type=jnp.float32) + b2_ref[...]
        logits = y[:bt] + y[bt:]                                     # (Bt, C)
        scale = jax.nn.sigmoid(logits)                               # (Bt, C)

        # ---- broadcast rescale in native dtype -------------------------------
        o_ref[...] = (x * scale[:, :, None].astype(x.dtype)).astype(o_ref.dtype)

    return kernel


def _vmem_capacity_bytes():
    """Physical VMEM of the current chip generation (fallback: v7x 64 MiB)."""
    try:
        return int(pltpu.get_tpu_info().vmem_capacity_bytes)
    except Exception:
        return 64 * 1024 * 1024


def channel_attention(x, w1, b1, w2, b2, *, tile_bytes_budget=None):
    """x: (B, C, H, W).  w1: (hidden, C), b1: (hidden,), w2: (C, hidden), b2: (C,)."""
    B, C, H, W = x.shape
    hidden = w1.shape[0]
    HW = H * W

    # No wrapper-level pad/slice: full (C, HW) extents in the block avoid the
    # extra HBM passes that padding HW up to a multiple of 128 would cost.
    x_flat = x.reshape(B, C, HW)

    vmem_cap = _vmem_capacity_bytes()
    if tile_bytes_budget is None:
        # Per-buffer tile budget: ~1/10 of physical VMEM leaves room for
        # double-buffered input + output tiles (4x) plus f32 temps + weights.
        # (~12.8 MiB on v5e/v6e, ~6.4 MiB on v7x.)
        tile_bytes_budget = vmem_cap // 10

    bytes_per_image = C * HW * x.dtype.itemsize
    max_bt = max(1, tile_bytes_budget // bytes_per_image)
    # Keep at least 2 grid steps when possible so the batch axis can shard
    # across both TensorCores on v7x (and pipeline on v5e/v6e).
    if B >= 2:
        max_bt = max(1, min(max_bt, B // 2))
    bt = 1
    for d in range(1, B + 1):
        if B % d == 0 and d <= max_bt:
            bt = d
    # TODO(synk): if a single image (C*HW*itemsize) ever exceeds the per-buffer
    # budget (huge feature maps on v7x's 64 MiB VMEM), switch to a two-pass
    # HW-tiled scheme: pass 1 accumulates f32 sum/max over an 'arbitrary' HW
    # grid axis into a resident (B, C) output, pass 2 rescales per HW tile.

    # Double-buffered input + output tiles + weights/temps, with headroom,
    # capped below the physical VMEM of the current chip generation.
    weight_bytes = 4 * (w1.size + b1.size + w2.size + b2.size)
    vmem_needed = 4 * bt * bytes_per_image + 2 * weight_bytes + (1 << 20)
    vmem_limit = int(min(max(32 * 1024 * 1024, int(vmem_needed * 1.5)),
                         int(vmem_cap * 0.85)))

    # Pre-transpose weights (exact) so the kernel does (2Bt, C) @ (C, hidden)
    # and (2Bt, hidden) @ (hidden, C) directly.
    w1t = w1.astype(jnp.float32).T            # (C, hidden)
    w2t = w2.astype(jnp.float32).T            # (hidden, C)
    b1r = b1.astype(jnp.float32).reshape(1, hidden)
    b2r = b2.astype(jnp.float32).reshape(1, C)

    itemsize = x.dtype.itemsize
    cost = pl.CostEstimate(
        flops=int(3 * B * C * HW + 8 * B * C * hidden),
        transcendentals=int(B * C),
        bytes_accessed=int(2 * B * C * HW * itemsize + weight_bytes),
    )

    out = pl.pallas_call(
        _make_kernel(HW),
        out_shape=jax.ShapeDtypeStruct((B, C, HW), x.dtype),
        grid_spec=pltpu.PrefetchScalarGridSpec(
            num_scalar_prefetch=0,
            grid=(B // bt,),
            in_specs=[
                pl.BlockSpec((bt, C, HW), lambda b: (b, 0, 0)),
                pl.BlockSpec((C, hidden), lambda b: (0, 0)),
                pl.BlockSpec((1, hidden), lambda b: (0, 0)),
                pl.BlockSpec((hidden, C), lambda b: (0, 0)),
                pl.BlockSpec((1, C), lambda b: (0, 0)),
            ],
            out_specs=pl.BlockSpec((bt, C, HW), lambda b: (b, 0, 0)),
        ),
        compiler_params=pltpu.CompilerParams(
            dimension_semantics=("parallel",),
            vmem_limit_bytes=vmem_limit,
        ),
        cost_estimate=cost,
    )(x_flat, w1t, b1r, w2t, b2r)

    return out.reshape(B, C, H, W)


def _reference(x, w1, b1, w2, b2):
    xf = x.astype(jnp.float32)
    avg = jnp.mean(xf, axis=(2, 3))                       # (B, C)
    mx = jnp.max(xf, axis=(2, 3))                         # (B, C)

    def mlp(v):
        return (v @ w1.T + b1) @ w2.T + b2

    out = mlp(avg) + mlp(mx)                              # (B, C)
    scale = jax.nn.sigmoid(out)[:, :, None, None]
    return (xf * scale).astype(x.dtype)


if __name__ == "__main__":
    B, C, H, W = 2, 32, 16, 16
    reduction_ratio = 16
    hidden = C // reduction_ratio                         # = 2

    key = jax.random.PRNGKey(0)
    kx, kw1, kb1, kw2, kb2 = jax.random.split(key, 5)

    x = jax.random.normal(kx, (B, C, H, W), dtype=jnp.float32)

    # PyTorch nn.Linear default init: U(-1/sqrt(fan_in), 1/sqrt(fan_in)).
    bound1 = 1.0 / (C ** 0.5)
    w1 = jax.random.uniform(kw1, (hidden, C), jnp.float32, -bound1, bound1)
    b1 = jax.random.uniform(kb1, (hidden,), jnp.float32, -bound1, bound1)
    bound2 = 1.0 / (hidden ** 0.5)
    w2 = jax.random.uniform(kw2, (C, hidden), jnp.float32, -bound2, bound2)
    b2 = jax.random.uniform(kb2, (C,), jnp.float32, -bound2, bound2)

    y = jax.block_until_ready(channel_attention(x, w1, b1, w2, b2))

    y_ref = _reference(x, w1, b1, w2, b2)
    assert y.shape == (B, C, H, W)
    assert jnp.allclose(y, y_ref, atol=1e-5, rtol=1e-5), "mismatch vs JAX reference"

    print("KERNEL_OK")
</pallas_src>

<mosaic_0001>
module attributes {stable_mosaic.version = 11 : i64} {
  func.func @kernel(%arg0: i32, %arg1: memref<1x32x256xf32, #tpu.memory_space<vmem>>, %arg2: memref<32x2xf32, #tpu.memory_space<vmem>>, %arg3: memref<1x2xf32, #tpu.memory_space<vmem>>, %arg4: memref<2x32xf32, #tpu.memory_space<vmem>>, %arg5: memref<1x32xf32, #tpu.memory_space<vmem>>, %arg6: memref<1x32x256xf32, #tpu.memory_space<vmem>>) attributes {dimension_semantics = [#tpu.dimension_semantics<parallel>], iteration_bounds = array<i64: 2>, scalar_prefetch = 0 : i64, scratch_operands = 0 : i64, tpu.core_type = #tpu.core_type<tc>, window_params = [{transform_indices = @transform_0, window_bounds = array<i64: 1, 32, 256>}, {pipeline_mode = #tpu.pipeline_mode<synchronous>, transform_indices = @transform_1, window_bounds = array<i64: 32, 2>}, {pipeline_mode = #tpu.pipeline_mode<synchronous>, transform_indices = @transform_2, window_bounds = array<i64: 1, 2>}, {pipeline_mode = #tpu.pipeline_mode<synchronous>, transform_indices = @transform_3, window_bounds = array<i64: 2, 32>}, {pipeline_mode = #tpu.pipeline_mode<synchronous>, transform_indices = @transform_4, window_bounds = array<i64: 1, 32>}, {transform_indices = @transform_5, window_bounds = array<i64: 1, 32, 256>}]} {
    %c0 = arith.constant 0 : index
    %c0_0 = arith.constant 0 : index
    %c0_1 = arith.constant 0 : index
    %0 = vector.load %arg1[%c0, %c0_0, %c0_1] : memref<1x32x256xf32, #tpu.memory_space<vmem>>, vector<1x32x256xf32>
    %cst = arith.constant dense<0.000000e+00> : vector<1x32xf32>
    %1 = vector.multi_reduction <add>, %0, %cst [2] : vector<1x32x256xf32> to vector<1x32xf32>
    %cst_2 = arith.constant 3.906250e-03 : f32
    %2 = vector.broadcast %cst_2 : f32 to vector<1x32xf32>
    %3 = arith.mulf %1, %2 : vector<1x32xf32>
    %cst_3 = arith.constant dense<0xFF800000> : vector<1x32xf32>
    %4 = vector.multi_reduction <maximumf>, %0, %cst_3 [2] : vector<1x32x256xf32> to vector<1x32xf32>
    %5 = tpu.concatenate %3, %4 in 0 : vector<1x32xf32>, vector<1x32xf32> -> vector<2x32xf32>
    %c0_4 = arith.constant 0 : index
    %c0_5 = arith.constant 0 : index
    %6 = vector.load %arg2[%c0_4, %c0_5] : memref<32x2xf32, #tpu.memory_space<vmem>>, vector<32x2xf32>
    %cst_6 = arith.constant dense<0.000000e+00> : vector<2x2xf32>
    %7 = tpu.matmul %5, %6, %cst_6 {dimension_numbers = #tpu.dot_dimension_numbers<[1], [0], [0], [1], [0, 0, 1, 1], [], []>} : vector<2x32xf32>, vector<32x2xf32>, vector<2x2xf32> -> vector<2x2xf32>
    %c0_7 = arith.constant 0 : index
    %c0_8 = arith.constant 0 : index
    %8 = vector.load %arg3[%c0_7, %c0_8] : memref<1x2xf32, #tpu.memory_space<vmem>>, vector<1x2xf32>
    %9 = vector.broadcast %8 : vector<1x2xf32> to vector<2x2xf32>
    %10 = arith.addf %7, %9 : vector<2x2xf32>
    %c0_9 = arith.constant 0 : index
    %c0_10 = arith.constant 0 : index
    %11 = vector.load %arg4[%c0_9, %c0_10] : memref<2x32xf32, #tpu.memory_space<vmem>>, vector<2x32xf32>
    %cst_11 = arith.constant dense<0.000000e+00> : vector<2x32xf32>
    %12 = tpu.matmul %10, %11, %cst_11 {dimension_numbers = #tpu.dot_dimension_numbers<[1], [0], [0], [1], [0, 0, 1, 1], [], []>} : vector<2x2xf32>, vector<2x32xf32>, vector<2x32xf32> -> vector<2x32xf32>
    %c0_12 = arith.constant 0 : index
    %c0_13 = arith.constant 0 : index
    %13 = vector.load %arg5[%c0_12, %c0_13] : memref<1x32xf32, #tpu.memory_space<vmem>>, vector<1x32xf32>
    %14 = vector.broadcast %13 : vector<1x32xf32> to vector<2x32xf32>
    %15 = arith.addf %12, %14 : vector<2x32xf32>
    %16 = vector.extract_strided_slice %15 {offsets = [0, 0], sizes = [1, 32], strides = [1, 1]} : vector<2x32xf32> to vector<1x32xf32>
    %17 = vector.extract_strided_slice %15 {offsets = [1, 0], sizes = [1, 32], strides = [1, 1]} : vector<2x32xf32> to vector<1x32xf32>
    %18 = arith.addf %16, %17 : vector<1x32xf32>
    %19 = arith.negf %18 : vector<1x32xf32>
    %20 = math.exp %19 : vector<1x32xf32>
    %cst_14 = arith.constant 1.000000e+00 : f32
    %21 = vector.broadcast %cst_14 : f32 to vector<1x32xf32>
    %22 = arith.addf %21, %20 : vector<1x32xf32>
    %23 = arith.divf %21, %22 : vector<1x32xf32>
    %24 = vector.shape_cast %23 : vector<1x32xf32> to vector<1x32x1xf32>
    %25 = vector.broadcast %24 : vector<1x32x1xf32> to vector<1x32x256xf32>
    %26 = arith.mulf %0, %25 : vector<1x32x256xf32>
    %c0_15 = arith.constant 0 : index
    %c0_16 = arith.constant 0 : index
    %c0_17 = arith.constant 0 : index
    %27 = vector.load %arg6[%c0_15, %c0_16, %c0_17] : memref<1x32x256xf32, #tpu.memory_space<vmem>>, vector<1x32x256xf32>
    tpu.vector_store %arg6[%c0_15, %c0_16, %c0_17], %26 {strides = array<i32>} : memref<1x32x256xf32, #tpu.memory_space<vmem>>, vector<1x32x256xf32>,
    return
  }
  func.func @transform_0(%arg0: i32) -> (i32, i32, i32) {
    %c0_i32 = arith.constant 0 : i32
    %c0_i32_0 = arith.constant 0 : i32
    %c0_i32_1 = arith.constant 0 : i32
    return %arg0, %c0_i32, %c0_i32_0 : i32, i32, i32
  }
  func.func @transform_1(%arg0: i32) -> (i32, i32) {
    %c0_i32 = arith.constant 0 : i32
    %c0_i32_0 = arith.constant 0 : i32
    %c0_i32_1 = arith.constant 0 : i32
    return %c0_i32, %c0_i32_0 : i32, i32
  }
  func.func @transform_2(%arg0: i32) -> (i32, i32) {
    %c0_i32 = arith.constant 0 : i32
    %c0_i32_0 = arith.constant 0 : i32
    %c0_i32_1 = arith.constant 0 : i32
    return %c0_i32, %c0_i32_0 : i32, i32
  }
  func.func @transform_3(%arg0: i32) -> (i32, i32) {
    %c0_i32 = arith.constant 0 : i32
    %c0_i32_0 = arith.constant 0 : i32
    %c0_i32_1 = arith.constant 0 : i32
    return %c0_i32, %c0_i32_0 : i32, i32
  }
  func.func @transform_4(%arg0: i32) -> (i32, i32) {
    %c0_i32 = arith.constant 0 : i32
    %c0_i32_0 = arith.constant 0 : i32
    %c0_i32_1 = arith.constant 0 : i32
    return %c0_i32, %c0_i32_0 : i32, i32
  }
  func.func @transform_5(%arg0: i32) -> (i32, i32, i32) {
    %c0_i32 = arith.constant 0 : i32
    %c0_i32_0 = arith.constant 0 : i32
    %c0_i32_1 = arith.constant 0 : i32
    return %arg0, %c0_i32, %c0_i32_0 : i32, i32, i32
  }
}

</mosaic_0001>

<bundles_post_ra>
// kernel: tpu_custom_call.1
= control target key start
LH: loop header
LB: loop body
LE: loop exit
PB: predicated region body
PF: predicated region fallthrough
CT: control target
= control target key end

     0   :  { %10 = vsyncpa [#allocation3], 0  ;;  %s1114_s0 = inlined_call_operand.hbm [shape: f32[2,32,256], index: 0, kind: input, shape index: {}]   ;;  %s1115_s1 = inlined_call_operand.vmem [shape: f32[32,2], index: 1, kind: input, shape index: {}]   ;;  %s1116_s2 = inlined_call_operand.vmem [shape: f32[1,2], index: 2, kind: input, shape index: {}]   ;;  %s1117_s3 = inlined_call_operand.vmem [shape: f32[2,32], index: 3, kind: input, shape index: {}]   ;;  %s1118_s4 = inlined_call_operand.vmem [shape: f32[1,32], index: 4, kind: input, shape index: {}]   ;;  %s1119_s5 = inlined_call_operand.hbm [shape: f32[2,32,256], index: 5, kind: output, shape index: {}]  }
   0x1   :  { %12 = vsyncpa [#allocation3 + $0x1], 0 }
   0x2   :  { %13 = vsyncpa [#allocation4], 0 }
   0x3   :  { %15 = vsyncpa [#allocation4 + $0x1], 0  ;;  %s885_s18 = smov 0   ;;  %s887_s19 = smov 0  }
   0x4   :  { %s889_s20 = smov 0   ;;  %s891_s21 = smov 0  }
   0x5 LB: > { %s906_s22 = sadd.s32 4294967295, %s844_s21   ;;  %s640_s23 = sadd.s32 4294967294, %s844_s21   ;;  %s844_s21 = sphi %s891_s21, %s1132_s21   ;;  %s840_s20 = sphi %s889_s20, %s1131_s20   ;;  %s836_s19 = sphi %s887_s19, %s1130_s19   ;;  %s832_s18 = sphi %s885_s18, %s1129_s18  }
   0x6   : > { %s910_s24 = sadd.s32 1, %s844_s21   ;;  %s28_s25 = sadd.s32 1, %s840_s20 }
   0x7   : > { %s25_s26 = ssub.s32 %s844_s21, %s910_s24  ;;  %p35_p0 = scmp.ne.s32.totalorder %s840_s20, %s836_s19 }
   0x8   : > { %p26_p1 = scmp.eq.s32.totalorder %s25_s26, 0  ;;  %p36_p2 = scmp.eq.s32.totalorder %s844_s21, 0 }
   0x9   : > { %p41_p3 = scmp.ne.s32.totalorder %s836_s19, %s832_s18  ;;  %p42_p4 = scmp.eq.s32.totalorder %s906_s22, 0 }
   0xa   : > { %s922_s27 = scalar_select %p26_p1, %s840_s20, %s28_s25  }
   0xb   : > { %p924_p5 = por %p36_p2, %p35_p0  ;;  %p928_p6 = por %p42_p4, %p41_p3 }
   0xc   : > { %p149_p7 = scmp.eq.s32.totalorder %s906_s22, 1  ;;  %p155_p8 = scmp.eq.s32.totalorder %s640_s23, 1 }
   0xd   : > { %p703_p10 = scmp.lt.s32.totalorder %s844_s21, 2  ;;  %s187_s7 = sand.u32 1, %s840_s20  }
   0xe   : > { %p935_p11 = por %p149_p7, %p35_p0  ;;  %p939_p12 = por %p155_p8, %p41_p3 }
   0xf   : > { %s660_s8 = sshll.u32 %s844_s21, 10  ;;  %s643_s9 = sshll.u32 %s187_s7, 6 }
  0x10   : > { %s1123_s30 = scalar_select %p935_p11, 1, 0 }
  0x11   : > { %s1124_s6 = scalar_select %p939_p12, 1, 0 }
  0x12   : > { %s948_s12 = scalar_lea.hbm %s1114_s0, %s660_s8  ;;  %s191_s13 = scalar_lea.vmem [#allocation2], %s643_s9 }
  0x13   : > { %s198_s14 = sshll.u32 %s191_s13, 4  ;;  %p952_p13 = pnand %p703_p10, %p924_p5  ;;  %s956_s14 = int_to_ptr.vmem [resolvable:$true] %s198_s14 }
  0x14   : > { %s958_s16 = scalar_lea.sflag [#allocation3], %s187_s7  ;;  %s748_s17 = scalar_lea.hbm %s948_s12, 1024 }
  0x15   : > { %p749_p0 = scmp.ne.s32.totalorder %s948_s12, %s748_s17  ;;  %p750_p1 = pneg %p952_p13 }
  0x16   : > { %s753_s26 = scalar_lea.hbm %s1114_s0, 2048  ;;  %p754_p4 = scmp.lt.u32.totalorder %s948_s12, %s1114_s0 }
  0x17   : > { %p751_p2 = pnand %p750_p1, %p749_p0  ;;  %p755_p5 = scmp.lt.u32.totalorder %s753_s26, %s748_s17 }
  0x18   : > { %p757_p8 = scmp.lt.u32.totalorder %s748_s17, %s948_s12 }
  0x19   : > { %p752_p3 = pneg %p751_p2  ;;  %p756_p7 = por %p755_p5, %p754_p4 }
  0x1b   : > { %p758_p10 = por %p757_p8, %p756_p7 }
  0x1d   : > { %p759_p9 = pnand %p758_p10, %p752_p3 }
  0x1f   : > { %762 = shalt.err (!%p759_p9)
}
  0x20   : > { %s763_s7 = scalar_lea.vmem %s956_s14, 1024  ;;  %s846_s9 = smov [#allocation2]  }
  0x21   : > { %p764_p0 = scmp.ne.s32.totalorder %s956_s14, %s763_s7  ;;  %s768_s10 = sshll.u32 %s846_s9, 4  ;;  %s769_s10 = int_to_ptr.vmem [resolvable:$false] %s768_s10 }
  0x22   : > { %s770_s11 = scalar_lea.vmem %s769_s10, 2048  ;;  %p771_p11 = scmp.lt.s32.totalorder %s956_s14, %s769_s10 }
  0x23   : > { %p766_p2 = pnand %p764_p0, %p750_p1  ;;  %p772_p4 = scmp.lt.s32.totalorder %s770_s11, %s763_s7 }
  0x25   : > { %p767_p12 = pneg %p766_p2  ;;  %p773_p5 = por %p772_p4, %p771_p11 }
  0x27   : > { %p774_p7 = pnand %p773_p5, %p767_p12 }
  0x29   : > { %777 = shalt.err (!%p774_p7)
}
  0x2a   : > { %s847_s13 = smov 256   ;;  %s848_s17 = smov 16  }
  0x2b   : > { %698 = dma.hbm_to_vmem [thread:$0]  (!%p952_p13), %s948_s12, 1024, %s956_s14, %s958_s16, %s847_s13, %s847_s13, %s848_s17  }
  0x2c   : > { %p646_p9 = scmp.ge.s32.totalorder %s844_s21, 1  ;;  %p206_p1 = scmp.lt.s32.totalorder %s844_s21, 3 }
  0x2e   : > { %p207_p3 = pnand %p646_p9, %p206_p1 }
  0x2f   : > { %s989_s23 = sand.u32 (!%p207_p3), 1, %s836_s19  }
  0x30   : > { %210 = sbr.rel (%p207_p3) target bundleno = 819 (0x333), region = 40  ;;  %s647_s25 = sshll.u32 (!%p207_p3), %s989_s23, 6 }
  0x31   : > { %s213_s26 = scalar_lea.sflag (!%p207_p3), [#allocation3], %s989_s23  ;;  %s216_s28 = scalar_lea.vmem (!%p207_p3), [#allocation2], %s647_s25 }
  0x37   : > { %823 = dma.done.wait (%p928_p6), %s213_s26, 1024  }
  0x38   : > { %825 = vsyncadd (%p928_p6), %s213_s26, 4294966272  ;;  %v999_v0 = vld [vmem:[%s216_s28 + $0x20] sm:$0xff]  ;;  %v1001_v1 = vld [vmem:[%s216_s28 + $0x28] sm:$0xff]  ;;  %v849_v19 = vmov 0.0|0.0   ;;  %vm850_vm0 = vmmov 0   ;;  %v851_v23 = vmov 0.0   ;;  %v283_v24 = vlaneseq }
  0x39   : > { %v1003_v2 = vld [vmem:[%s216_s28] sm:$0xff]  ;;  %v257_v3 = vadd.f32 %v1001_v1, %v999_v0  ;;  %v1007_v4 = vld [vmem:[%s216_s28 + $0x8] sm:$0xff]  ;;  %v1009_v5 = vld [vmem:[%s216_s28 + $0x30] sm:$0xff]  ;;  %v273_v15 = vmax.f32 %v999_v0, %v1001_v1  ;;  %685 = vmatprep.subr.bf16.mxu0 %v849_v19  ;;  %677 = vmatprep.mubr.msk.f32.mxu0 %vm850_vm0, %v851_v23  ;;  %vm294_vm1 = vcmask 130112   ;;  %vm301_vm2 = vcmask 195712   ;;  %s242_s29 = scalar_lea.vmem [#allocation5], %s647_s25 }
  0x3a   : > { %v1011_v6 = vld [vmem:[%s216_s28 + $0x38] sm:$0xff]  ;;  %v251_v7 = vadd.f32 %v1007_v4, %v1003_v2  ;;  %v1015_v8 = vld [vmem:[%s216_s28 + $0x10] sm:$0xff]  ;;  %v267_v13 = vmax.f32 %v1003_v2, %v1007_v4  ;;  %v337_v16 = vld [vmem:[%s1115_s1] sm:$0xff]  ;;  %680 = vmatprep.subr.mxu1 %v851_v23  ;;  %682 = vmatprep.mubr.msk.f32.mxu1 %vm850_vm0, %v851_v23  ;;  %v284_v25 = vand.u32 127, %v283_v24  ;;  %v286_v28 = vshrl.u32 %v283_v24, 7  ;;  %s567_s12 = sshll.u32 %s242_s29, 4  ;;  %s1063_s12 = int_to_ptr.vmem [resolvable:$true] %s567_s12 }
  0x3b   : > { %v1017_v9 = vld [vmem:[%s216_s28 + $0x18] sm:$0xff]  ;;  %258 = vadd.xlane.f32.xlu1 %v257_v3  ;;  %v260_v10 = vadd.f32 %v1011_v6, %v1009_v5  ;;  %v276_v14 = vmax.f32 %v1009_v5, %v1011_v6  ;;  %v338_v17 = vld [vmem:[%s1115_s1 + $0x8] sm:$0xff]  ;;  %v339_v20 = vld [vmem:[%s1115_s1 + $0x10] sm:$0xff]  ;;  %vm308_vm3 = vcmask 261312   ;;  %vm335_vm4 = vcmask 1040384   ;;  %s661_s14 = sshll.u32 %s906_s22, 10 }
  0x3c   : > { %252 = vadd.xlane.f32.xlu0 %v251_v7  ;;  %v254_v11 = vadd.f32 %v1017_v9, %v1015_v8  ;;  %v270_v12 = vmax.f32 %v1015_v8, %v1017_v9  ;;  %v686_v18 = vpack.c.bf16 %v338_v17, %v337_v16  ;;  %v340_v21 = vld [vmem:[%s1115_s1 + $0x18] sm:$0xff]  ;;  %v289_v27 = vadd.s32 4294967288, %v284_v25  ;;  %v422_v61 = vld [vmem:[%s1117_s3] sm:$0x3]  ;;  %s1068_s16 = scalar_lea.hbm %s1119_s5, %s661_s14  ;;  %s554_s22 = scalar_lea.sflag [#allocation4], %s989_s23 }
  0x3d   : > { %v689_v22 = vpack.c.bf16 %v340_v21, %v339_v20  ;;  %v296_v30 = vadd.s32 4294967280, %v284_v25  ;;  %v287_v33 = vsub.s32 %v284_v25, %v286_v28  ;;  %v303_v35 = vadd.s32 4294967272, %v284_v25  ;;  %v649_v62 = vld [vmem:[%s1116_s2] ss:$0 sm:$0xff]  ;;  %s778_s8 = scalar_lea.vmem %s1063_s12, 1024  ;;  %p1126_p11 = scmp.ne.s32.totalorder %s1123_s30, 0 }
  0x3e   : > { %687 = vmatpush3.bf16.msra.mxu0 %v686_v18  ;;  %v292_v32 = vsub.s32 %v289_v27, %v286_v28  ;;  %vm348_vm5 = vcmask 261120   ;;  %vm434_vm6 = vcmask 1041408   ;;  %vm430_vm7 = vcmask 15360   ;;  %p779_p6 = scmp.ne.s32.totalorder %s1063_s12, %s778_s8  ;;  %s852_s7 = smov [#allocation5]  }
  0x3f   : > { %261 = vadd.xlane.f32.xlu1 %v260_v10  ;;  %688 = vmatprep.subr.bf16.mxu0 %v849_v19  ;;  %v299_v38 = vsub.s32 %v296_v30, %v286_v28  ;;  %v306_v43 = vsub.s32 %v303_v35, %v286_v28  ;;  %v651_v10 = vld [vmem:[%s1118_s4] ss:$0 sm:$0xff]  ;;  %v520_v19 = vsub.s32 0, %v286_v28  ;;  %s782_s9 = sshll.u32 %s852_s7, 4  ;;  %s783_s9 = int_to_ptr.vmem [resolvable:$false] %s782_s9 }
  0x40   : > { %255 = vadd.xlane.f32.xlu0 %v254_v11  ;;  %681 = vmatpush3.msk.msra.mxu1 %vm434_vm6, %v422_v61  ;;  %p780_p12 = pnand %p779_p6, %p1126_p11  ;;  %s784_s10 = scalar_lea.vmem %s783_s9, 2048 }
  0x41   : > { %p785_p8 = scmp.lt.s32.totalorder %s1063_s12, %s783_s9  ;;  %p786_p10 = scmp.lt.s32.totalorder %s784_s10, %s778_s8 }
  0x42   : > { %690 = vmatpush3.bf16.msra.mxu0 %v689_v22  ;;  %p781_p13 = pneg %p780_p12 }
  0x43   : > { %271 = vmax.xlane.f32.xlu1 %v270_v12  ;;  %p787_p0 = por %p786_p10, %p785_p8 }
  0x44   : > { %268 = vmax.xlane.f32.xlu0 %v267_v13 }
  0x45   : > { %p788_p2 = pnand %p787_p0, %p781_p13 }
  0x47   : > { %277 = vmax.xlane.f32.xlu1 %v276_v14 }
  0x48   : > { %274 = vmax.xlane.f32.xlu0 %v273_v15 }
  0xc8   : > { %v259_v26 = vpop.xlane.xlu1 %258 }
  0xc9   : > { %v253_v29 = vpop.xlane.xlu0 %252  ;;  %v265_v39 = vmul.f32 0.00390625, %v259_v26 }
  0xca   : > { %v263_v34 = vmul.f32 0.00390625, %v253_v29 }
  0xcb   : > { %v300_v49 = vrot.slane %v265_v39, %v299_v38 }
  0xcc   : > { %v262_v31 = vpop.xlane.xlu1 %261  ;;  %v288_v42 = vrot.slane %v263_v34, %v287_v33 }
  0xcd   : > { %v256_v36 = vpop.xlane.xlu0 %255  ;;  %v266_v44 = vmul.f32 0.00390625, %v262_v31 }
  0xce   : > { %v264_v37 = vmul.f32 0.00390625, %v256_v36 }
  0xcf   : > { %v307_v51 = vrot.slane %v266_v44, %v306_v43 }
  0xd0   : > { %v293_v40 = vrot.slane %v264_v37, %v292_v32  ;;  %v272_v41 = vpop.xlane.xlu1 %271 }
  0xd1   : > { %v269_v45 = vpop.xlane.xlu0 %268  ;;  %v322_v47 = vrot.slane %v272_v41, %v292_v32 }
  0xd2   : > { %v295_v46 = vsel %vm294_vm1, %v293_v40, %v288_v42  ;;  %v318_v48 = vrot.slane %v269_v45, %v287_v33 }
  0xd3   : > { %v302_v55 = vsel %vm301_vm2, %v300_v49, %v295_v46 }
  0xd4   : > { %v278_v50 = vpop.xlane.xlu1 %277  ;;  %v323_v56 = vsel %vm294_vm1, %v322_v47, %v318_v48  ;;  %v309_v59 = vsel %vm308_vm3, %v307_v51, %v302_v55 }
  0xd5   : > { %v275_v52 = vpop.xlane.xlu0 %274  ;;  %v332_v53 = vrot.slane %v278_v50, %v306_v43 }
  0xd6   : > { %v327_v54 = vrot.slane %v275_v52, %v299_v38 }
  0xd8   : > { %v328_v57 = vsel %vm301_vm2, %v327_v54, %v323_v56 }
  0xd9   : > { %v333_v58 = vsel %vm308_vm3, %v332_v53, %v328_v57 }
  0xda   : > { %v336_v60 = vsel %vm335_vm4, %v309_v59, %v333_v58 }
  0xdb   : > { %678 = vmatmul.mubr.msk.f32.vlgmr.msra.gmra.mrb[0].mxu0 %vm348_vm5, %v336_v60 }
 0x1ae   : > { %v418_v63 = vpop.f32.mrb[0].mxu0 }
 0x1af   : > { %v419_v3 = vadd.f32 %v649_v62, %v418_v63  ;;  %v679_v7 = vpop.f32.mrb[1].mxu0 }
 0x1b1   : > { %683 = vmatmul.mubr.msk.f32.vlgmr.msra.gmra.mrb[0].mxu1 %vm430_vm7, %v419_v3 }
 0x284   : > { %v504_v11 = vpop.f32.mrb[0].mxu1 }
 0x285   : > { %v505_v12 = vadd.f32 %v651_v10, %v504_v11  ;;  %v684_v13 = vpop.f32.mrb[1].mxu1 }
 0x287   : > { %v509_v14 = vrot.slane %v505_v12, 1 }
 0x289   : > { %v511_v15 = vadd.f32 %v509_v14, %v505_v12 }
 0x28b   : > { %v654_v16 = vmul.f32 -1.442695, %v511_v15 }
 0x28d   : > { %744 = vpow2.f32 %v654_v16 }
 0x297   : > { %v745_v17 = vpop.eup %744 }
 0x298   : > { %v515_v18 = vadd.f32 1.0, %v745_v17 }
 0x29a   : > { %746 = vrcp.f32 %v515_v18 }
 0x2a4   : > { %v747_v20 = vpop.eup %746 }
 0x2a5   : > { %v521_v21 = vrot.slane %v747_v20, %v520_v19 }
 0x2a7   : > { %527 = vbcast.lane.b32.xlu1 %v521_v21, 264  ;;  %523 = vbcast.lane.b32.xlu0 %v521_v21, 256 }
 0x2ab   : > { %531 = vbcast.lane.b32.xlu1 %v521_v21, 272 }
 0x2af   : > { %535 = vbcast.lane.b32.xlu1 %v521_v21, 280 }
 0x319   : > { %v528_v22 = vpop.permute.xlu1 %527  ;;  %v524_v23 = vpop.permute.xlu0 %523 }
 0x31a   : > { %v539_v24 = vmul.f32 %v528_v22, %v1015_v8  ;;  %v540_v25 = vmul.f32 %v528_v22, %v1017_v9  ;;  %v537_v26 = vmul.f32 %v524_v23, %v1003_v2  ;;  %v538_v27 = vmul.f32 %v524_v23, %v1007_v4 }
 0x31c   : > { %547 = vst [vmem:[%s242_s29 + $0x10] sm:$0xff] %v539_v24  ;;  %548 = vst [vmem:[%s242_s29 + $0x18] sm:$0xff] %v540_v25 }
 0x31d   : > { %545 = vst [vmem:[%s242_s29] sm:$0xff] %v537_v26  ;;  %546 = vst [vmem:[%s242_s29 + $0x8] sm:$0xff] %v538_v27  ;;  %v532_v28 = vpop.permute.xlu1 %531 }
 0x31e   : > { %v541_v29 = vmul.f32 %v532_v28, %v999_v0  ;;  %v542_v8 = vmul.f32 %v532_v28, %v1001_v1 }
 0x320   : > { %549 = vst [vmem:[%s242_s29 + $0x20] sm:$0xff] %v541_v29  ;;  %550 = vst [vmem:[%s242_s29 + $0x28] sm:$0xff] %v542_v8 }
 0x321   : > { %v536_v2 = vpop.permute.xlu1 %535 }
 0x322   : > { %v543_v4 = vmul.f32 %v536_v2, %v1009_v5  ;;  %v544_v0 = vmul.f32 %v536_v2, %v1011_v6 }
 0x324   : > { %551 = vst [vmem:[%s242_s29 + $0x30] sm:$0xff] %v543_v4  ;;  %552 = vst [vmem:[%s242_s29 + $0x38] sm:$0xff] %v544_v0 }
 0x325   : > { %791 = shalt.err (!%p788_p2)
}
 0x326   : > { %s792_s11 = scalar_lea.hbm %s1068_s16, 1024  ;;  %s796_s26 = scalar_lea.hbm %s1119_s5, 2048 }
 0x327   : > { %p793_p4 = scmp.ne.s32.totalorder %s1068_s16, %s792_s11  ;;  %p797_p9 = scmp.lt.u32.totalorder %s1068_s16, %s1119_s5 }
 0x328   : > { %p798_p1 = scmp.lt.u32.totalorder %s796_s26, %s792_s11  ;;  %p800_p6 = scmp.lt.u32.totalorder %s792_s11, %s1068_s16 }
 0x329   : > { %p794_p5 = pnand %p793_p4, %p1126_p11 }
 0x32a   : > { %p799_p3 = por %p798_p1, %p797_p9 }
 0x32b   : > { %p795_p7 = pneg %p794_p5 }
 0x32c   : > { %p801_p12 = por %p800_p6, %p799_p3 }
 0x32e   : > { %p802_p13 = pnand %p801_p12, %p795_p7 }
 0x330   : > { %805 = shalt.err (!%p802_p13)
}
 0x331   : > { %s853_s14 = smov 256   ;;  %s854_s25 = smov 16  }
 0x332   : > { %693 = dma.vmem_to_hbm [thread:$0]  (%p1126_p11), %s1063_s12, 1024, %s1068_s16, %s554_s22, %s853_s14, %s853_s14, %s854_s25  }
 0x333 PF: > { %s582_s15 = sand.u32 1, %s832_s18   ;;  %p1127_p8 = scmp.ne.s32.totalorder %s1124_s6, 0 }
 0x334   : > { %p1128_p10 = scmp.ge.s32.totalorder %s844_s21, 2  ;;  %s583_s8 = scalar_lea.sflag [#allocation4], %s582_s15 }
 0x336   : > { %p700_p0 = pnand %p1128_p10, %p1127_p8 }
 0x338   : > { %827 = dma.done.wait (!%p700_p0), %s583_s8, 1024  }
 0x339   : > { %829 = vsyncadd (!%p700_p0), %s583_s8, 4294966272  ;;  %p18_p2 = scmp.ge.s32.totalorder %s910_s24, 4   ;;  %s1129_s18 = smov %s836_s19 }
 0x33a   : > { %s1130_s19 = smov %s840_s20  ;;  %s1131_s20 = smov %s922_s27 }
 0x33b   : > { %s1132_s21 = smov %s910_s24  ;;  %20 = sbr.rel (!%p18_p2) target bundleno = 5 (0x5), region = 85 }
 0x342   :  { %588 = vsyncpa [#allocation3], 1 }
 0x343   :  { %590 = vsyncpa [#allocation3 + $0x1], 1 }
 0x344   :  { %591 = vsyncpa [#allocation4], 1 }
 0x345   :  { %593 = vsyncpa [#allocation4 + $0x1], 1 }

</bundles_post_ra>
